<compile_context>
chip_gen: v6e
topology: v6e:2x2x1
jax: 0.10.0
libtpu: 0.0.40
codegen_flags: <defaults>
</compile_context>

<pallas_src>
import jax
import jax.numpy as jnp
from jax.experimental import pallas as pl
from jax.experimental.pallas import tpu as pltpu

SUBLANE = 8   # f32 sublane granularity: batch tiles are multiples of this


def _round_up(n, m):
    return ((n + m - 1) // m) * m


def mlp_kernel(x_ref, w1_ref, b1_ref, w2_ref, b2_ref, o_ref):
    # fc1: f32 MXU matmul (HBM-bound kernel -> f32 MXU rate is free) + bias + ReLU.
    h = jnp.dot(x_ref[...], w1_ref[...], preferred_element_type=jnp.float32)
    h = jnp.maximum(h + b1_ref[...], 0.0)          # b1 is (1, H) -> broadcasts over rows
    # fc2 + bias + ReLU.
    y = jnp.dot(h, w2_ref[...], preferred_element_type=jnp.float32)
    y = jnp.maximum(y + b2_ref[...], 0.0)
    o_ref[...] = y.astype(o_ref.dtype)


def prepare_params(w1, b1, w2, b2):
    """One-time parameter prep, hoisted out of the forward pass.

    Weights are stored [in_features, out_features] so the kernel computes x @ W + b;
    biases become (1, out_features) rows for broadcast inside the kernel.
    """
    f32 = jnp.float32
    return (jnp.asarray(w1, f32),
            jnp.asarray(b1, f32).reshape(1, -1),
            jnp.asarray(w2, f32),
            jnp.asarray(b2, f32).reshape(1, -1))


def _choose_batch_tile(B, target_rows=256):
    # >= 2 tiles, rounded to an even tile count so v7x's two TensorCores see balanced
    # work on the "parallel" axis; each tile a multiple of the f32 sublane width.
    n_tiles = max(2, pl.cdiv(B, target_rows))
    n_tiles = _round_up(n_tiles, 2)
    return _round_up(pl.cdiv(B, n_tiles), SUBLANE)


def baseline_net_forward(x, params):
    """BaselineNet forward: relu(relu(x @ w1 + b1) @ w2 + b2).

    x: [B, D]; params = prepare_params(w1, b1, w2, b2) with w1: [D, H], w2: [H, O].
    """
    w1, b1, w2, b2 = params
    B, D = x.shape
    H = w1.shape[1]
    O = w2.shape[1]

    tm = _choose_batch_tile(B)
    grid = (pl.cdiv(B, tm),)   # ragged last tile handled by Pallas masked boundary stores

    # VMEM: double-buffered x/out tiles + resident weights/biases + f32 intermediate h.
    vmem_need = (2 * tm * D * 4 + 2 * tm * O * 4
                 + 2 * (D * H + H * O + H + O) * 4
                 + tm * H * 4)
    vmem_limit = int(min(max(2 * vmem_need, 32 * 1024 * 1024), 64 * 1024 * 1024))

    grid_spec = pltpu.PrefetchScalarGridSpec(
        num_scalar_prefetch=0,
        grid=grid,
        in_specs=[
            pl.BlockSpec((tm, D), lambda i: (i, 0)),   # x: tiled along batch, D unpadded
            pl.BlockSpec((D, H), lambda i: (0, 0)),    # w1: resident across grid steps
            pl.BlockSpec((1, H), lambda i: (0, 0)),    # b1: resident
            pl.BlockSpec((H, O), lambda i: (0, 0)),    # w2: resident
            pl.BlockSpec((1, O), lambda i: (0, 0)),    # b2: resident
        ],
        out_specs=pl.BlockSpec((tm, O), lambda i: (i, 0)),   # O kept at true (narrow) width
    )

    return pl.pallas_call(
        mlp_kernel,
        out_shape=jax.ShapeDtypeStruct((B, O), x.dtype),
        grid_spec=grid_spec,
        compiler_params=pltpu.CompilerParams(
            dimension_semantics=("parallel",),   # batch tiles shard across TCs on v7x
            vmem_limit_bytes=vmem_limit,
        ),
    )(x, w1, b1, w2, b2)


def init_linear(key, fan_in, fan_out, dtype=jnp.float32):
    """Deterministic init matching nn.Linear's default (uniform +/- 1/sqrt(fan_in))."""
    k_w, k_b = jax.random.split(key)
    bound = 1.0 / float(fan_in) ** 0.5
    # PyTorch stores weight as [out, in]; we keep [in, out] for x @ W.
    w = jax.random.uniform(k_w, (fan_in, fan_out), dtype, -bound, bound)
    b = jax.random.uniform(k_b, (fan_out,), dtype, -bound, bound)
    return w, b


def _reference(x, w1, b1, w2, b2):
    return jnp.maximum(jnp.maximum(x @ w1 + b1, 0.0) @ w2 + b2, 0.0)


if __name__ == "__main__":
    # Shapes consistent with the module: input_dim=32, hidden_dim_1=64, output_dim=16.
    input_dim, hidden_dim_1, output_dim = 32, 64, 16

    key = jax.random.PRNGKey(0)
    k_x, k_fc1, k_fc2, k_x2 = jax.random.split(key, 4)
    w1, b1 = init_linear(k_fc1, input_dim, hidden_dim_1)
    w2, b2 = init_linear(k_fc2, hidden_dim_1, output_dim)
    params = prepare_params(w1, b1, w2, b2)   # one-time prep, hoisted out of forward

    # Small batch: single grid step, all feature dims at their true (unpadded) sizes.
    x_small = jax.random.normal(k_x, (8, input_dim), jnp.float32)
    out_small = jax.block_until_ready(baseline_net_forward(x_small, params))
    ref_small = _reference(x_small, w1, b1, w2, b2)
    assert out_small.shape == (8, output_dim)
    # f32 inputs; residual tolerance covers default-precision MXU passes.
    assert jnp.allclose(out_small, ref_small, atol=2e-2, rtol=2e-2), (
        float(jnp.max(jnp.abs(out_small - ref_small))))

    # Larger batch: exercises the parallel batch grid (4 tiles of 152 rows, ragged last).
    x_big = jax.random.normal(k_x2, (600, input_dim), jnp.float32)
    out_big = jax.block_until_ready(baseline_net_forward(x_big, params))
    ref_big = _reference(x_big, w1, b1, w2, b2)
    assert out_big.shape == (600, output_dim)
    assert jnp.allclose(out_big, ref_big, atol=2e-2, rtol=2e-2), (
        float(jnp.max(jnp.abs(out_big - ref_big))))

    print("KERNEL_OK")
</pallas_src>

<mosaic_0001>
module attributes {stable_mosaic.version = 11 : i64} {
  func.func @mlp_kernel(%arg0: i32, %arg1: memref<8x32xf32, #tpu.memory_space<vmem>>, %arg2: memref<32x64xf32, #tpu.memory_space<vmem>>, %arg3: memref<1x64xf32, #tpu.memory_space<vmem>>, %arg4: memref<64x16xf32, #tpu.memory_space<vmem>>, %arg5: memref<1x16xf32, #tpu.memory_space<vmem>>, %arg6: memref<8x16xf32, #tpu.memory_space<vmem>>) attributes {dimension_semantics = [#tpu.dimension_semantics<parallel>], iteration_bounds = array<i64: 1>, scalar_prefetch = 0 : i64, scratch_operands = 0 : i64, tpu.core_type = #tpu.core_type<tc>, window_params = [{transform_indices = @transform_0, window_bounds = array<i64: 8, 32>}, {pipeline_mode = #tpu.pipeline_mode<synchronous>, transform_indices = @transform_1, window_bounds = array<i64: 32, 64>}, {pipeline_mode = #tpu.pipeline_mode<synchronous>, transform_indices = @transform_2, window_bounds = array<i64: 1, 64>}, {pipeline_mode = #tpu.pipeline_mode<synchronous>, transform_indices = @transform_3, window_bounds = array<i64: 64, 16>}, {pipeline_mode = #tpu.pipeline_mode<synchronous>, transform_indices = @transform_4, window_bounds = array<i64: 1, 16>}, {transform_indices = @transform_5, window_bounds = array<i64: 8, 16>}]} {
    %c0 = arith.constant 0 : index
    %c0_0 = arith.constant 0 : index
    %0 = vector.load %arg1[%c0, %c0_0] : memref<8x32xf32, #tpu.memory_space<vmem>>, vector<8x32xf32>
    %c0_1 = arith.constant 0 : index
    %c0_2 = arith.constant 0 : index
    %1 = vector.load %arg2[%c0_1, %c0_2] : memref<32x64xf32, #tpu.memory_space<vmem>>, vector<32x64xf32>
    %cst = arith.constant dense<0.000000e+00> : vector<8x64xf32>
    %2 = tpu.matmul %0, %1, %cst {dimension_numbers = #tpu.dot_dimension_numbers<[1], [0], [0], [1], [0, 0, 1, 1], [], []>} : vector<8x32xf32>, vector<32x64xf32>, vector<8x64xf32> -> vector<8x64xf32>
    %c0_3 = arith.constant 0 : index
    %c0_4 = arith.constant 0 : index
    %3 = vector.load %arg3[%c0_3, %c0_4] : memref<1x64xf32, #tpu.memory_space<vmem>>, vector<1x64xf32>
    %4 = vector.broadcast %3 : vector<1x64xf32> to vector<8x64xf32>
    %5 = arith.addf %2, %4 : vector<8x64xf32>
    %cst_5 = arith.constant 0.000000e+00 : f32
    %6 = vector.broadcast %cst_5 : f32 to vector<8x64xf32>
    %7 = arith.maximumf %5, %6 : vector<8x64xf32>
    %c0_6 = arith.constant 0 : index
    %c0_7 = arith.constant 0 : index
    %8 = vector.load %arg4[%c0_6, %c0_7] : memref<64x16xf32, #tpu.memory_space<vmem>>, vector<64x16xf32>
    %cst_8 = arith.constant dense<0.000000e+00> : vector<8x16xf32>
    %9 = tpu.matmul %7, %8, %cst_8 {dimension_numbers = #tpu.dot_dimension_numbers<[1], [0], [0], [1], [0, 0, 1, 1], [], []>} : vector<8x64xf32>, vector<64x16xf32>, vector<8x16xf32> -> vector<8x16xf32>
    %c0_9 = arith.constant 0 : index
    %c0_10 = arith.constant 0 : index
    %10 = vector.load %arg5[%c0_9, %c0_10] : memref<1x16xf32, #tpu.memory_space<vmem>>, vector<1x16xf32>
    %11 = vector.broadcast %10 : vector<1x16xf32> to vector<8x16xf32>
    %12 = arith.addf %9, %11 : vector<8x16xf32>
    %cst_11 = arith.constant 0.000000e+00 : f32
    %13 = vector.broadcast %cst_11 : f32 to vector<8x16xf32>
    %14 = arith.maximumf %12, %13 : vector<8x16xf32>
    %c0_12 = arith.constant 0 : index
    %c0_13 = arith.constant 0 : index
    %15 = vector.load %arg6[%c0_12, %c0_13] : memref<8x16xf32, #tpu.memory_space<vmem>>, vector<8x16xf32>
    tpu.vector_store %arg6[%c0_12, %c0_13], %14 {strides = array<i32>} : memref<8x16xf32, #tpu.memory_space<vmem>>, vector<8x16xf32>,
    return
  }
  func.func @transform_0(%arg0: i32) -> (i32, i32) {
    %c0_i32 = arith.constant 0 : i32
    %c0_i32_0 = arith.constant 0 : i32
    return %arg0, %c0_i32 : i32, i32
  }
  func.func @transform_1(%arg0: i32) -> (i32, i32) {
    %c0_i32 = arith.constant 0 : i32
    %c0_i32_0 = arith.constant 0 : i32
    %c0_i32_1 = arith.constant 0 : i32
    return %c0_i32, %c0_i32_0 : i32, i32
  }
  func.func @transform_2(%arg0: i32) -> (i32, i32) {
    %c0_i32 = arith.constant 0 : i32
    %c0_i32_0 = arith.constant 0 : i32
    %c0_i32_1 = arith.constant 0 : i32
    return %c0_i32, %c0_i32_0 : i32, i32
  }
  func.func @transform_3(%arg0: i32) -> (i32, i32) {
    %c0_i32 = arith.constant 0 : i32
    %c0_i32_0 = arith.constant 0 : i32
    %c0_i32_1 = arith.constant 0 : i32
    return %c0_i32, %c0_i32_0 : i32, i32
  }
  func.func @transform_4(%arg0: i32) -> (i32, i32) {
    %c0_i32 = arith.constant 0 : i32
    %c0_i32_0 = arith.constant 0 : i32
    %c0_i32_1 = arith.constant 0 : i32
    return %c0_i32, %c0_i32_0 : i32, i32
  }
  func.func @transform_5(%arg0: i32) -> (i32, i32) {
    %c0_i32 = arith.constant 0 : i32
    %c0_i32_0 = arith.constant 0 : i32
    return %arg0, %c0_i32 : i32, i32
  }
}

</mosaic_0001>

<bundles_post_ra>
// kernel: tpu_custom_call.1
= control target key start
LH: loop header
LB: loop body
LE: loop exit
PB: predicated region body
PF: predicated region fallthrough
CT: control target
= control target key end

     0   :  { %v287_v1 = vmov 0.0   ;;  %vm288_vm0 = vmmov 0   ;;  %s370_s0 = inlined_call_operand.vmem [shape: f32[8,32], index: 0, kind: input, shape index: {}]   ;;  %s371_s1 = inlined_call_operand.vmem [shape: f32[32,64], index: 1, kind: input, shape index: {}]   ;;  %s372_s2 = inlined_call_operand.vmem [shape: f32[1,64], index: 2, kind: input, shape index: {}]   ;;  %s373_s3 = inlined_call_operand.vmem [shape: f32[64,16], index: 3, kind: input, shape index: {}]   ;;  %s374_s4 = inlined_call_operand.vmem [shape: f32[1,16], index: 4, kind: input, shape index: {}]   ;;  %s375_s5 = inlined_call_operand.hbm [shape: f32[8,16], index: 5, kind: output, shape index: {}]  }
   0x1   :  { %v25_v0 = vld [vmem:[%s371_s1 + $0x18] sm:$0xff]  ;;  %232 = vmatprep.subr.mxu0 %v287_v1  ;;  %v24_v2 = vld [vmem:[%s371_s1 + $0x10] sm:$0xff]  ;;  %240 = vmatprep.mubr.msk.f32.mxu0 %vm288_vm0, %v287_v1  ;;  %v23_v5 = vld [vmem:[%s371_s1 + $0x8] sm:$0xff] }
   0x2   :  { %v115_v3 = vld [vmem:[%s373_s3 + $0x38] sm:$0xff]  ;;  %233 = vmatpush3.msra.mxu0 %v25_v0  ;;  %243 = vmatprep.subr.mxu1 %v287_v1  ;;  %v114_v4 = vld [vmem:[%s373_s3 + $0x30] sm:$0xff] }
   0x3   :  { %234 = vmatprep.subr.mxu0 %v287_v1  ;;  %244 = vmatpush3.msra.mxu1 %v115_v3 }
   0x4   :  { %10 = vsyncpa [#allocation3], 0  ;;  %235 = vmatpush3.msra.mxu0 %v24_v2  ;;  %245 = vmatprep.subr.mxu1 %v287_v1  ;;  %v113_v6 = vld [vmem:[%s373_s3 + $0x28] sm:$0xff]  ;;  %v22_v7 = vld [vmem:[%s371_s1] sm:$0xff]  ;;  %vm33_vm1 = vcmask 261120   ;;  %vm123_vm2 = vcmask 523264  }
   0x5   :  { %236 = vmatprep.subr.mxu0 %v287_v1  ;;  %246 = vmatpush3.msra.mxu1 %v114_v4  ;;  %v21_v8 = vld [vmem:[%s370_s0] sm:$0xff]  ;;  %v111_v10 = vld [vmem:[%s373_s3 + $0x18] sm:$0xff]  ;;  %v110_v11 = vld [vmem:[%s373_s3 + $0x10] sm:$0xff]  ;;  %s289_s21 = smov [#allocation2]   ;;  %vm198_vm3 = vcmask 130048  }
   0x6   :  { %237 = vmatpush3.msra.mxu0 %v23_v5  ;;  %247 = vmatprep.subr.mxu1 %v287_v1  ;;  %v112_v9 = vld [vmem:[%s373_s3 + $0x20] sm:$0xff]  ;;  %v109_v12 = vld [vmem:[%s373_s3 + $0x8] sm:$0xff]  ;;  %s206_s22 = sshll.u32 %s289_s21, 4  ;;  %s207_s22 = int_to_ptr.vmem [resolvable:$true] %s206_s22 }
   0x7   :  { %238 = vmatprep.subr.mxu0 %v287_v1  ;;  %248 = vmatpush3.msra.mxu1 %v113_v6  ;;  %v108_v13 = vld [vmem:[%s373_s3] sm:$0xff]  ;;  %p270_p1 = scmp.lt.s32.totalorder %s207_s22, %s207_s22 }
   0x8   :  { %239 = vmatpush3.msra.mxu0 %v22_v7  ;;  %249 = vmatprep.subr.mxu1 %v287_v1  ;;  %v214_v14 = vld [vmem:[%s372_s2] ss:$0 sm:$0xff]  ;;  %s265_s2 = scalar_lea.vmem %s207_s22, 128 }
   0x9   :  { %241 = vmatmul.mubr.msk.f32.vlgmr.msra.gmra.mxu0 %vm33_vm1, %v21_v8  ;;  %250 = vmatpush3.msra.mxu1 %v112_v9  ;;  %v216_v19 = vld [vmem:[%s374_s4] ss:$0 sm:$0xff]  ;;  %p266_p0 = scmp.ne.s32.totalorder %s207_s22, %s265_s2  ;;  %p271_p2 = scmp.lt.s32.totalorder %s265_s2, %s265_s2 }
   0xa   :  { %251 = vmatprep.subr.mxu1 %v287_v1  ;;  %259 = vmatprep.mubr.msk.f32.mxu1 %vm288_vm0, %v287_v1 }
   0xb   :  { %252 = vmatpush3.msra.mxu1 %v111_v10  ;;  %p272_p3 = por %p271_p2, %p270_p1 }
   0xc   :  { %253 = vmatprep.subr.mxu1 %v287_v1 }
   0xd   :  { %254 = vmatpush3.msra.mxu1 %v110_v11  ;;  %p273_p4 = pnand %p272_p3, %p266_p0 }
   0xe   :  { %255 = vmatprep.subr.mxu1 %v287_v1 }
   0xf   :  { %256 = vmatpush3.msra.mxu1 %v109_v12 }
  0x10   :  { %257 = vmatprep.subr.mxu1 %v287_v1 }
  0x11   :  { %258 = vmatpush3.msra.mxu1 %v108_v13 }
  0xc9   :  { %v103_v15 = vpop.f32.mrf.mxu0 }
  0xca   :  { %v104_v16 = vadd.f32 %v214_v14, %v103_v15 }
  0xcb   :  { %v242_v17 = vpop.f32.mrf.mxu0 }
  0xcc   :  { %v107_v18 = vmax.f32 %v104_v16, 0.0 }
  0xce   :  { %260 = vmatmul.mubr.msk.f32.vlgmr.msra.gmra.mxu1 %vm123_vm2, %v107_v18 }
 0x18e   :  { %v193_v20 = vpop.f32.mrf.mxu1 }
 0x18f   :  { %v194_v21 = vadd.f32 %v216_v19, %v193_v20 }
 0x190   :  { %v261_v22 = vpop.f32.mrf.mxu1 }
 0x191   :  { %v197_v23 = vmax.f32 %v194_v21, 0.0 }
 0x193   :  { %199 = vst.msk [vmem:[#allocation2] sm:$0xff] %vm198_vm3, %v197_v23 }
 0x194   :  { %276 = shalt.err (!%p273_p4)
}
 0x195   :  { %209 = dma.vmem_to_hbm [thread:$0]  %s207_s22, 128, %s375_s5, [#allocation3]  }
 0x196   :  { %285 = dma.done.wait [#allocation3], 128  }
 0x197   :  { %286 = vsyncadd [#allocation3], 4294967168 }
 0x198   :  { %213 = vsyncpa [#allocation3], 1 }

</bundles_post_ra>
